<compile_context>
chip_gen: v7x
topology: tpu7x:2x2x1
jax: 0.10.0
libtpu: 0.0.40
codegen_flags: <defaults>
</compile_context>

<pallas_src>
import jax
import jax.numpy as jnp
from jax.experimental import pallas as pl
from jax.experimental.pallas import tpu as pltpu


def _make_zero_pad_kernel(ph: int, pw: int, H: int, W: int):
    def zero_pad_kernel(x_ref, o_ref):
        # x_ref: (TB, H, W) VMEM;  o_ref: (TB, H+2ph, W+2pw) VMEM
        tb, ho, wo = o_ref.shape
        dt = o_ref.dtype
        if ph == 0 and pw == 0:
            o_ref[...] = x_ref[...]
            return
        # Zero only the halo stripes; interior stored exactly once below
        # (matters for v5e's single vst slot).
        if ph > 0:
            zrow = jnp.zeros((tb, ph, wo), dt)
            o_ref[:, :ph, :] = zrow
            o_ref[:, ph + H:, :] = zrow
        if pw > 0:
            zcol = jnp.zeros((tb, H, pw), dt)
            o_ref[:, ph:ph + H, :pw] = zcol
            o_ref[:, ph:ph + H, pw + W:] = zcol
        o_ref[:, ph:ph + H, pw:pw + W] = x_ref[...]

    return zero_pad_kernel


def _round_up(x: int, m: int) -> int:
    return ((x + m - 1) // m) * m


def _padded_plane_vmem_bytes(rows: int, cols: int, dtype) -> int:
    """Actual VMEM bytes of one (rows, cols) plane after (sublane, 128) tiling."""
    itemsize = jnp.dtype(dtype).itemsize
    sublane_tile = 8 * max(1, 4 // itemsize)  # f32: 8, bf16: 16, int8: 32
    return (_round_up(max(rows, 1), sublane_tile)
            * _round_up(max(cols, 1), 128) * itemsize)


def _divisors(n: int):
    ds = []
    i = 1
    while i * i <= n:
        if n % i == 0:
            ds.append(i)
            if i != n // i:
                ds.append(n // i)
        i += 1
    return sorted(ds)


def _choose_block_planes(nc: int, per_plane_buffered_bytes: int,
                         budget_bytes: int = 40 << 20) -> int:
    """Largest divisor of nc whose double-buffered footprint fits the budget."""
    planes_target = max(1, budget_bytes // max(1, per_plane_buffered_bytes))
    divs = _divisors(nc)
    fitting = [d for d in divs if d <= planes_target]
    tb = max(fitting) if fitting else 1
    # Keep >=2 grid steps when possible so v7x can shard across both TCs.
    if tb == nc and nc > 1:
        smaller = [d for d in divs if d <= nc // 2]
        if smaller:
            tb = max(smaller)
    return tb


def zero_pad(x: jax.Array, pad) -> jax.Array:
    """Equivalent of Zero(pad)(x) for NCHW input `x`.

    `pad` may be an int (same padding on the two last dims), a 1-tuple (last
    dim only) or a 2-tuple (ph, pw), matching the PyTorch module.
    """
    if isinstance(pad, int):
        ph = pw = pad
    else:
        pad = tuple(pad)
        if len(pad) == 1:
            ph, pw = 0, pad[0]
        elif len(pad) == 2:
            ph, pw = pad[0], pad[1]
        else:
            # TODO(synk): general N-tuple padding over >2 trailing dims not implemented.
            raise NotImplementedError("only int / 1-tuple / 2-tuple padding supported")

    N, C, H, W = x.shape
    if ph == 0 and pw == 0:
        return x  # identity under F.pad semantics; skip kernel launch entirely.

    Ho, Wo = H + 2 * ph, W + 2 * pw
    NC = N * C
    itemsize = jnp.dtype(x.dtype).itemsize

    # Leading-dim reshape: no data movement, just collapses (N, C) for tiling.
    xf = x.reshape(NC, H, W)

    # Tile-padded (real) VMEM cost per plane, double-buffered, in + out.
    in_pp = _padded_plane_vmem_bytes(H, W, x.dtype)
    out_pp = _padded_plane_vmem_bytes(Ho, Wo, x.dtype)
    per_plane_buffered = 2 * (in_pp + out_pp)

    tb = _choose_block_planes(NC, per_plane_buffered)
    grid = (NC // tb,)

    footprint = tb * per_plane_buffered
    # Headroom for compiler scratch / semaphores; capped under v7x's 64 MiB VMEM/TC.
    vmem_limit = int(min(max(footprint + (4 << 20), 16 << 20), 60 << 20))

    kernel = _make_zero_pad_kernel(ph, pw, H, W)

    out = pl.pallas_call(
        kernel,
        out_shape=jax.ShapeDtypeStruct((NC, Ho, Wo), x.dtype),
        grid_spec=pltpu.PrefetchScalarGridSpec(
            num_scalar_prefetch=0,
            grid=grid,
            in_specs=[pl.BlockSpec((tb, H, W), lambda i: (i, 0, 0))],
            out_specs=pl.BlockSpec((tb, Ho, Wo), lambda i: (i, 0, 0)),
        ),
        compiler_params=pltpu.CompilerParams(
            dimension_semantics=("parallel",),
            vmem_limit_bytes=vmem_limit,
        ),
        cost_estimate=pl.CostEstimate(
            flops=0,
            transcendentals=0,
            bytes_accessed=(NC * H * W + NC * Ho * Wo) * itemsize,
        ),
    )(xf)
    return out.reshape(N, C, Ho, Wo)


if __name__ == "__main__":
    key = jax.random.PRNGKey(0)
    N, C, H, W = 2, 4, 16, 16
    x = jax.random.normal(key, (N, C, H, W), dtype=jnp.float32)

    # Symmetric int padding (as in Zero(2)).
    pad = 2
    out = jax.block_until_ready(zero_pad(x, pad))
    ref = jnp.pad(x, ((0, 0), (0, 0), (pad, pad), (pad, pad)),
                  mode="constant", constant_values=0.0)
    assert out.shape == (N, C, H + 2 * pad, W + 2 * pad)
    assert out.dtype == x.dtype
    assert jnp.allclose(out, ref)

    # Asymmetric tuple padding (H padded by 1, W padded by 2), as Zero((1, 2)).
    out2 = jax.block_until_ready(zero_pad(x, (1, 2)))
    ref2 = jnp.pad(x, ((0, 0), (0, 0), (1, 1), (2, 2)),
                   mode="constant", constant_values=0.0)
    assert out2.shape == ref2.shape
    assert jnp.allclose(out2, ref2)

    # 1-tuple padding (last dim only), as Zero((3,)).
    out3 = jax.block_until_ready(zero_pad(x, (3,)))
    ref3 = jnp.pad(x, ((0, 0), (0, 0), (0, 0), (3, 3)),
                   mode="constant", constant_values=0.0)
    assert out3.shape == ref3.shape
    assert jnp.allclose(out3, ref3)

    print("KERNEL_OK")
</pallas_src>

<mosaic_0001>
module attributes {stable_mosaic.version = 11 : i64} {
  func.func @zero_pad_kernel(%arg0: i32, %arg1: memref<4x16x16xf32, #tpu.memory_space<vmem>>, %arg2: memref<4x20x20xf32, #tpu.memory_space<vmem>>) attributes {dimension_semantics = [#tpu.dimension_semantics<parallel>], iteration_bounds = array<i64: 2>, scalar_prefetch = 0 : i64, scratch_operands = 0 : i64, tpu.core_type = #tpu.core_type<tc>, window_params = [{transform_indices = @transform_0, window_bounds = array<i64: 4, 16, 16>}, {transform_indices = @transform_1, window_bounds = array<i64: 4, 20, 20>}]} {
    %cst = arith.constant 0.000000e+00 : f32
    %0 = vector.broadcast %cst : f32 to vector<4x2x20xf32>
    %c0 = arith.constant 0 : index
    %c0_0 = arith.constant 0 : index
    %c0_1 = arith.constant 0 : index
    %1 = vector.load %arg2[%c0, %c0_0, %c0_1] : memref<4x20x20xf32, #tpu.memory_space<vmem>>, vector<4x2x20xf32>
    tpu.vector_store %arg2[%c0, %c0_0, %c0_1], %0 {strides = array<i32>} : memref<4x20x20xf32, #tpu.memory_space<vmem>>, vector<4x2x20xf32>,
    %c0_2 = arith.constant 0 : index
    %c18 = arith.constant 18 : index
    %c0_3 = arith.constant 0 : index
    %2 = vector.load %arg2[%c0_2, %c18, %c0_3] : memref<4x20x20xf32, #tpu.memory_space<vmem>>, vector<4x2x20xf32>
    tpu.vector_store %arg2[%c0_2, %c18, %c0_3], %0 {strides = array<i32>} : memref<4x20x20xf32, #tpu.memory_space<vmem>>, vector<4x2x20xf32>,
    %cst_4 = arith.constant 0.000000e+00 : f32
    %3 = vector.broadcast %cst_4 : f32 to vector<4x16x2xf32>
    %c0_5 = arith.constant 0 : index
    %c2 = arith.constant 2 : index
    %c0_6 = arith.constant 0 : index
    %4 = vector.load %arg2[%c0_5, %c2, %c0_6] : memref<4x20x20xf32, #tpu.memory_space<vmem>>, vector<4x16x2xf32>
    tpu.vector_store %arg2[%c0_5, %c2, %c0_6], %3 {strides = array<i32>} : memref<4x20x20xf32, #tpu.memory_space<vmem>>, vector<4x16x2xf32>,
    %c0_7 = arith.constant 0 : index
    %c2_8 = arith.constant 2 : index
    %c18_9 = arith.constant 18 : index
    %5 = vector.load %arg2[%c0_7, %c2_8, %c18_9] : memref<4x20x20xf32, #tpu.memory_space<vmem>>, vector<4x16x2xf32>
    tpu.vector_store %arg2[%c0_7, %c2_8, %c18_9], %3 {strides = array<i32>} : memref<4x20x20xf32, #tpu.memory_space<vmem>>, vector<4x16x2xf32>,
    %c0_10 = arith.constant 0 : index
    %c0_11 = arith.constant 0 : index
    %c0_12 = arith.constant 0 : index
    %6 = vector.load %arg1[%c0_10, %c0_11, %c0_12] : memref<4x16x16xf32, #tpu.memory_space<vmem>>, vector<4x16x16xf32>
    %c0_13 = arith.constant 0 : index
    %c2_14 = arith.constant 2 : index
    %c2_15 = arith.constant 2 : index
    %7 = vector.load %arg2[%c0_13, %c2_14, %c2_15] : memref<4x20x20xf32, #tpu.memory_space<vmem>>, vector<4x16x16xf32>
    tpu.vector_store %arg2[%c0_13, %c2_14, %c2_15], %6 {strides = array<i32>} : memref<4x20x20xf32, #tpu.memory_space<vmem>>, vector<4x16x16xf32>,
    return
  }
  func.func @transform_0(%arg0: i32) -> (i32, i32, i32) {
    %c0_i32 = arith.constant 0 : i32
    %c0_i32_0 = arith.constant 0 : i32
    %c0_i32_1 = arith.constant 0 : i32
    return %arg0, %c0_i32, %c0_i32_0 : i32, i32, i32
  }
  func.func @transform_1(%arg0: i32) -> (i32, i32, i32) {
    %c0_i32 = arith.constant 0 : i32
    %c0_i32_0 = arith.constant 0 : i32
    %c0_i32_1 = arith.constant 0 : i32
    return %arg0, %c0_i32, %c0_i32_0 : i32, i32, i32
  }
}

</mosaic_0001>

<bundles_post_ra>
// kernel: tpu_custom_call.1
= control target key start
LH: loop header
LB: loop body
LE: loop exit
PB: predicated region body
PF: predicated region fallthrough
CT: control target
= control target key end

     0   :  { %6 = vsyncpa [#allocation3], 0  ;;  %s619_s0 = inlined_call_operand.hbm [shape: f32[8,16,16], index: 0, kind: input, shape index: {}]   ;;  %s620_s1 = inlined_call_operand.vmem [shape: f32[8,20,20], index: 1, kind: output, shape index: {}]  }
   0x1   :  { %8 = vsyncpa [#allocation3 + $0x1], 0  ;;  %s428_s6 = smov 0   ;;  %s430_s7 = smov 0  }
   0x2   :  { %s432_s8 = smov 0   ;;  %s434_s9 = smov 0  }
   0x3 LB: > { %s287_s10 = sadd.s32 4294967295, %s411_s9   ;;  %s448_s11 = sadd.s32 1, %s411_s9   ;;  %s411_s9 = sphi %s434_s9, %s627_s9   ;;  %s407_s8 = sphi %s432_s8, %s626_s8   ;;  %s403_s7 = sphi %s430_s7, %s625_s7   ;;  %s399_s6 = sphi %s428_s6, %s624_s6  }
   0x4   : > { %s18_s12 = ssub.s32 %s411_s9, %s448_s11  ;;  %s21_s13 = sadd.s32 1, %s407_s8 }
   0x5   : > { %p19_p0 = scmp.eq.s32.totalorder %s18_s12, 0  ;;  %p28_p1 = scmp.ne.s32.totalorder %s407_s8, %s403_s7 }
   0x6   : > { %p29_p2 = scmp.eq.s32.totalorder %s411_s9, 0  ;;  %p34_p3 = scmp.ne.s32.totalorder %s403_s7, %s399_s6 }
   0x7   : > { %s458_s14 = scalar_select %p19_p0, %s407_s8, %s21_s13  }
   0x8   : > { %p30_p4 = por %p29_p2, %p28_p1  ;;  %p35_p5 = scmp.eq.s32.totalorder %s287_s10, 0 }
   0x9   : > { %p310_p6 = scmp.lt.s32.totalorder %s411_s9, 2  ;;  %s84_s16 = sand.u32 1, %s407_s8  }
   0xa   : > { %p463_p7 = por %p35_p5, %p34_p3  ;;  %s291_s17 = sshll.u32 %s84_s16, 6 }
   0xb   : > { %s302_s18 = sshll.u32 %s411_s9, 10  ;;  %s88_s22 = scalar_lea.vmem [#allocation2], %s291_s17 }
   0xc   : > { %s472_s21 = scalar_lea.hbm %s619_s0, %s302_s18  ;;  %s96_s23 = sshll.u32 %s88_s22, 4  ;;  %s474_s23 = int_to_ptr.vmem [resolvable:$true] %s96_s23 }
   0xd   : > { %p476_p8 = pnand %p310_p6, %p30_p4  ;;  %s481_s25 = scalar_lea.sflag [#allocation3], %s84_s16 }
   0xe   : > { %s347_s26 = scalar_lea.hbm %s472_s21, 1024  ;;  %s352_s29 = scalar_lea.hbm %s619_s0, 2048 }
   0xf   : > { %p348_p10 = scmp.ne.s32.totalorder %s472_s21, %s347_s26  ;;  %p349_p11 = pneg %p476_p8 }
  0x10   : > { %p353_p0 = scmp.lt.u32.totalorder %s472_s21, %s619_s0  ;;  %p354_p1 = scmp.lt.u32.totalorder %s352_s29, %s347_s26 }
  0x11   : > { %p350_p12 = pnand %p349_p11, %p348_p10  ;;  %p356_p3 = scmp.lt.u32.totalorder %s347_s26, %s472_s21 }
  0x12   : > { %p355_p2 = por %p354_p1, %p353_p0 }
  0x13   : > { %p351_p13 = pneg %p350_p12 }
  0x14   : > { %p357_p4 = por %p356_p3, %p355_p2 }
  0x16   : > { %p358_p5 = pnand %p357_p4, %p351_p13 }
  0x18   : > { %361 = shalt.err (!%p358_p5)
}
  0x19   : > { %s362_s3 = scalar_lea.vmem %s474_s23, 1024  ;;  %s413_s4 = smov [#allocation2]  }
  0x1a   : > { %p363_p6 = scmp.ne.s32.totalorder %s474_s23, %s362_s3  ;;  %s367_s5 = sshll.u32 %s413_s4, 4  ;;  %s368_s5 = int_to_ptr.vmem [resolvable:$false] %s367_s5 }
  0x1b   : > { %s369_s6 = scalar_lea.vmem %s368_s5, 2048  ;;  %p370_p9 = scmp.lt.s32.totalorder %s474_s23, %s368_s5 }
  0x1c   : > { %p365_p10 = pnand %p363_p6, %p349_p11  ;;  %p371_p0 = scmp.lt.s32.totalorder %s369_s6, %s362_s3 }
  0x1e   : > { %p366_p12 = pneg %p365_p10  ;;  %p372_p1 = por %p371_p0, %p370_p9 }
  0x20   : > { %p373_p2 = pnand %p372_p1, %p366_p12 }
  0x22   : > { %376 = shalt.err (!%p373_p2)
}
  0x23   : > { %s414_s12 = smov 128   ;;  %s415_s13 = smov 8  }
  0x24   : > { %309 = dma.hbm_to_vmem [thread:$0]  (!%p476_p8), %s472_s21, 1024, %s474_s23, %s481_s25, %s414_s12, %s414_s12, %s415_s13  }
  0x25   : > { %p104_p11 = scmp.lt.s32.totalorder %s411_s9, 3  ;;  %p623_p13 = scmp.ge.s32.totalorder %s411_s9, 1 }
  0x27   : > { %p105_p3 = pnand %p623_p13, %p104_p11 }
  0x28   : > { %s110_s16 = sand.u32 (!%p105_p3), 1, %s403_s7  }
  0x29   : > { %108 = sbr.rel (%p105_p3) target bundleno = 179 (0xb3), region = 24  ;;  %s296_s17 = sshll.u32 (!%p105_p3), %s110_s16, 6 }
  0x2a   : > { %s111_s18 = scalar_lea.sflag (!%p105_p3), [#allocation3], %s110_s16  ;;  %s513_s19 = scalar_lea.vmem (!%p105_p3), [#allocation2], %s296_s17 }
  0x30   : > { %394 = dma.done.wait (%p463_p7), %s111_s18, 1024  }
  0x31   : > { %396 = vsyncadd (%p463_p7), %s111_s18, 4294966272  ;;  %s297_s20 = sshll.u32 %s287_s10, 2  ;;  %vm142_vm0 = vcmask 156672   ;;  %vm151_vm1 = vcmask 15360   ;;  %v171_v0 = vld [vmem:[%s513_s19 + $0x10] sm:$0xff]  ;;  %v169_v1 = vld [vmem:[%s513_s19] sm:$0xff] }
  0x32   : > { %p136_p8 = scmp.lt.s32.totalorder %s297_s20, 7  ;;  %v416_v2 = vmov 0.0   ;;  %s417_s9 = smov 2   ;;  %v172_v3 = vld [vmem:[%s513_s19 + $0x18] sm:$0xff]  ;;  %v170_v4 = vld [vmem:[%s513_s19 + $0x8] sm:$0xff]  ;;  %vm160_vm2 = vcmask 162960  }
  0x33   : > { %189 = vrot.lane.b32.xlu1 %v171_v0, %s417_s9  ;;  %185 = vrot.lane.b32.xlu0 %v169_v1, %s417_s9  ;;  %v174_v5 = vld [vmem:[%s513_s19 + $0x28] sm:$0xff]  ;;  %v173_v6 = vld [vmem:[%s513_s19 + $0x20] sm:$0xff]  ;;  %vm209_vm3 = vcmask 146448  }
  0x34   : > { %s629_s20 = smov (!%p136_p8, %s297_s20), 7  ;;  %v176_v7 = vld [vmem:[%s513_s19 + $0x38] sm:$0xff]  ;;  %v175_v8 = vld [vmem:[%s513_s19 + $0x30] sm:$0xff] }
  0x35   : > { %s303_s21 = smul.u32 24, %s629_s20 }
  0x37   : > { %s524_s24 = scalar_lea.vmem %s620_s1, %s303_s21  ;;  %191 = vrot.lane.b32.xlu1 %v172_v3, %s417_s9  ;;  %187 = vrot.lane.b32.xlu0 %v170_v4, %s417_s9 }
  0x38   : > { %143 = vst.msk [vmem:[%s524_s24] sm:$0x3] %vm142_vm0, %v416_v2  ;;  %147 = vst.msk [vmem:[%s524_s24 + $0x12] sm:$0x3] %vm142_vm0, %v416_v2 }
  0x39   : > { %152 = vst.msk [vmem:[%s524_s24 + $0x2] sm:$0xff] %vm151_vm1, %v416_v2  ;;  %153 = vst.msk [vmem:[%s524_s24 + $0xa] sm:$0xff] %vm151_vm1, %v416_v2 }
  0x3a   : > { %144 = vst.msk [vmem:[%s524_s24 + $0x18] sm:$0x3] %vm142_vm0, %v416_v2  ;;  %148 = vst.msk [vmem:[%s524_s24 + $0x2a] sm:$0x3] %vm142_vm0, %v416_v2 }
  0x3b   : > { %154 = vst.msk [vmem:[%s524_s24 + $0x1a] sm:$0xff] %vm151_vm1, %v416_v2  ;;  %155 = vst.msk [vmem:[%s524_s24 + $0x22] sm:$0xff] %vm151_vm1, %v416_v2  ;;  %195 = vrot.lane.b32.xlu1 %v174_v5, %s417_s9  ;;  %193 = vrot.lane.b32.xlu0 %v173_v6, %s417_s9 }
  0x3c   : > { %145 = vst.msk [vmem:[%s524_s24 + $0x30] sm:$0x3] %vm142_vm0, %v416_v2  ;;  %149 = vst.msk [vmem:[%s524_s24 + $0x42] sm:$0x3] %vm142_vm0, %v416_v2 }
  0x3d   : > { %156 = vst.msk [vmem:[%s524_s24 + $0x32] sm:$0xff] %vm151_vm1, %v416_v2  ;;  %157 = vst.msk [vmem:[%s524_s24 + $0x3a] sm:$0xff] %vm151_vm1, %v416_v2 }
  0x3e   : > { %146 = vst.msk [vmem:[%s524_s24 + $0x48] sm:$0x3] %vm142_vm0, %v416_v2  ;;  %150 = vst.msk [vmem:[%s524_s24 + $0x5a] sm:$0x3] %vm142_vm0, %v416_v2 }
  0x3f   : > { %158 = vst.msk [vmem:[%s524_s24 + $0x4a] sm:$0xff] %vm151_vm1, %v416_v2  ;;  %159 = vst.msk [vmem:[%s524_s24 + $0x52] sm:$0xff] %vm151_vm1, %v416_v2  ;;  %199 = vrot.lane.b32.xlu1 %v176_v7, %s417_s9  ;;  %197 = vrot.lane.b32.xlu0 %v175_v8, %s417_s9 }
  0x40   : > { %161 = vst.msk [vmem:[%s524_s24 + $0x2] sm:$0xff] %vm160_vm2, %v416_v2  ;;  %162 = vst.msk [vmem:[%s524_s24 + $0xa] sm:$0xff] %vm160_vm2, %v416_v2 }
  0x41   : > { %163 = vst.msk [vmem:[%s524_s24 + $0x1a] sm:$0xff] %vm160_vm2, %v416_v2  ;;  %164 = vst.msk [vmem:[%s524_s24 + $0x22] sm:$0xff] %vm160_vm2, %v416_v2 }
  0x42   : > { %165 = vst.msk [vmem:[%s524_s24 + $0x32] sm:$0xff] %vm160_vm2, %v416_v2  ;;  %166 = vst.msk [vmem:[%s524_s24 + $0x3a] sm:$0xff] %vm160_vm2, %v416_v2 }
  0x43   : > { %167 = vst.msk [vmem:[%s524_s24 + $0x4a] sm:$0xff] %vm160_vm2, %v416_v2  ;;  %168 = vst.msk [vmem:[%s524_s24 + $0x52] sm:$0xff] %vm160_vm2, %v416_v2 }
  0xa5   : > { %v190_v9 = vpop.permute.xlu1 %189  ;;  %v186_v10 = vpop.permute.xlu0 %185 }
  0xa6   : > { %210 = vst.msk [vmem:[%s524_s24 + $0x2] sm:$0xff] %vm209_vm3, %v186_v10  ;;  %212 = vst.msk [vmem:[%s524_s24 + $0x1a] sm:$0xff] %vm209_vm3, %v190_v9 }
  0xa9   : > { %v192_v11 = vpop.permute.xlu1 %191  ;;  %v188_v12 = vpop.permute.xlu0 %187 }
  0xaa   : > { %211 = vst.msk [vmem:[%s524_s24 + $0xa] sm:$0xff] %vm209_vm3, %v188_v12  ;;  %213 = vst.msk [vmem:[%s524_s24 + $0x22] sm:$0xff] %vm209_vm3, %v192_v11 }
  0xad   : > { %v196_v13 = vpop.permute.xlu1 %195  ;;  %v194_v14 = vpop.permute.xlu0 %193 }
  0xae   : > { %215 = vst.msk [vmem:[%s524_s24 + $0x3a] sm:$0xff] %vm209_vm3, %v196_v13  ;;  %214 = vst.msk [vmem:[%s524_s24 + $0x32] sm:$0xff] %vm209_vm3, %v194_v14 }
  0xb1   : > { %v200_v15 = vpop.permute.xlu1 %199  ;;  %v198_v16 = vpop.permute.xlu0 %197 }
  0xb2   : > { %217 = vst.msk [vmem:[%s524_s24 + $0x52] sm:$0xff] %vm209_vm3, %v200_v15  ;;  %216 = vst.msk [vmem:[%s524_s24 + $0x4a] sm:$0xff] %vm209_vm3, %v198_v16 }
  0xb3 PF: > { %p11_p7 = scmp.ge.s32.totalorder %s448_s11, 4   ;;  %s624_s6 = smov %s403_s7 }
  0xb4   : > { %s625_s7 = smov %s407_s8  ;;  %s626_s8 = smov %s458_s14 }
  0xb5   : > { %s627_s9 = smov %s448_s11  ;;  %13 = sbr.rel (!%p11_p7) target bundleno = 3 (0x3), region = 64 }
  0xbc   :  { %242 = vsyncpa [#allocation3], 1 }
  0xbd   :  { %244 = vsyncpa [#allocation3 + $0x1], 1 }

</bundles_post_ra>
